<compile_context>
chip_gen: v6e
topology: v6e:2x2x1
jax: 0.10.0
libtpu: 0.0.40
codegen_flags: <defaults>
</compile_context>

<pallas_src>
import jax
import jax.numpy as jnp
from jax.experimental import pallas as pl
from jax.experimental.pallas import tpu as pltpu


def channel_attention_kernel(x_ref, w1_ref, b1_ref, w2_ref, b2_ref, o_ref):
    # x_ref block: (1, C, HW) -- one batch element, HW on lanes, C on sublanes.
    x = x_ref[0]                                   # (C, HW)
    hw = x.shape[-1]

    # Global average pool over the spatial (lane) axis.
    gap = jnp.sum(x, axis=-1, keepdims=True) * jnp.float32(1.0 / hw)   # (C, 1)
    # nn.Dropout on the pooled vector is identity in eval mode.

    # fc1 (column form): hidden = ReLU(W1 @ gap + b1); W1 is torch (Cr, C).
    hidden = jnp.dot(w1_ref[...], gap,
                     preferred_element_type=jnp.float32) + b1_ref[...]   # (Crp, 1)
    hidden = jnp.maximum(hidden, 0.0)

    # fc2 (column form): att = sigmoid(W2 @ hidden + b2); W2 is torch (C, Cr).
    att = jnp.dot(w2_ref[...], hidden,
                  preferred_element_type=jnp.float32) + b2_ref[...]      # (C, 1)
    att = jax.nn.sigmoid(att)

    # Gate: (C, 1) broadcasts over the lane (spatial) axis.
    o_ref[0] = (x * att).astype(o_ref.dtype)


def channel_attention_forward(x_nchw, w1, b1, w2, b2):
    """Eval-mode ChannelAttention.  Weights are in torch Linear layout:
       w1: (C//r, C), b1: (C//r,), w2: (C, C//r), b2: (C,)."""
    B, C, H, W = x_nchw.shape
    HW = H * W
    Cr = w1.shape[0]
    Crp = max(Cr, 8)  # pad hidden dim to a full sublane group (exact padding)

    w1p = jnp.zeros((Crp, C), jnp.float32).at[:Cr, :].set(w1.astype(jnp.float32))
    b1p = jnp.zeros((Crp, 1), jnp.float32).at[:Cr, 0].set(b1.astype(jnp.float32))
    w2p = jnp.zeros((C, Crp), jnp.float32).at[:, :Cr].set(w2.astype(jnp.float32))
    b2p = b2.reshape(C, 1).astype(jnp.float32)

    # NCHW -> (B, C, H*W): contiguous reshape, spatial axis lands on lanes.
    x = x_nchw.reshape(B, C, HW).astype(jnp.float32)
    # TODO(synk): for very large H*W a spatial-tiled two-pass variant (reduce
    # pass + gated multiply pass) would bound per-step VMEM further; at these
    # sizes one (C, H*W) slab per step is already small (32 KiB).

    y = pl.pallas_call(
        channel_attention_kernel,
        out_shape=jax.ShapeDtypeStruct((B, C, HW), jnp.float32),
        grid=(B,),
        in_specs=[
            pl.BlockSpec((1, C, HW), lambda b: (b, 0, 0)),   # per-batch slab
            pl.BlockSpec((Crp, C), lambda b: (0, 0)),         # weights stay
            pl.BlockSpec((Crp, 1), lambda b: (0, 0)),         # resident
            pl.BlockSpec((C, Crp), lambda b: (0, 0)),
            pl.BlockSpec((C, 1), lambda b: (0, 0)),
        ],
        out_specs=pl.BlockSpec((1, C, HW), lambda b: (b, 0, 0)),
        compiler_params=pltpu.CompilerParams(
            dimension_semantics=("parallel",)),
    )(x, w1p, b1p, w2p, b2p)

    return y.reshape(B, C, H, W)


def channel_attention_ref(x, w1, b1, w2, b2):
    """Pure-JAX reference with identical (eval-mode) semantics."""
    gap = jnp.mean(x, axis=(2, 3))                                   # (B, C)
    h = jnp.maximum(gap @ w1.T + b1, 0.0)                            # (B, Cr)
    att = jax.nn.sigmoid(h @ w2.T + b2)                              # (B, C)
    return x * att[:, :, None, None]


if __name__ == "__main__":
    key = jax.random.PRNGKey(0)
    kx, k1, k2, k3, k4 = jax.random.split(key, 5)

    # dim must be >= reduction_ratio (16) for the hidden Linear to be non-empty.
    B, C, H, W = 2, 32, 16, 16
    reduction = 16
    Cr = C // reduction

    x = jax.random.normal(kx, (B, C, H, W), dtype=jnp.float32)
    w1 = jax.random.normal(k1, (Cr, C), dtype=jnp.float32) / jnp.sqrt(C)
    b1 = jax.random.normal(k2, (Cr,), dtype=jnp.float32) * 0.1
    w2 = jax.random.normal(k3, (C, Cr), dtype=jnp.float32) / jnp.sqrt(Cr)
    b2 = jax.random.normal(k4, (C,), dtype=jnp.float32) * 0.1

    out = channel_attention_forward(x, w1, b1, w2, b2)
    out = jax.block_until_ready(out)

    ref = channel_attention_ref(x, w1, b1, w2, b2)
    assert out.shape == (B, C, H, W)
    assert jnp.allclose(out, ref, rtol=1e-4, atol=1e-4), float(
        jnp.max(jnp.abs(out - ref)))

    print("KERNEL_OK")
</pallas_src>

<mosaic_0001>
module attributes {stable_mosaic.version = 11 : i64} {
  func.func @channel_attention_kernel(%arg0: i32, %arg1: memref<1x32x256xf32, #tpu.memory_space<vmem>>, %arg2: memref<8x32xf32, #tpu.memory_space<vmem>>, %arg3: memref<8x1xf32, #tpu.memory_space<vmem>>, %arg4: memref<32x8xf32, #tpu.memory_space<vmem>>, %arg5: memref<32x1xf32, #tpu.memory_space<vmem>>, %arg6: memref<1x32x256xf32, #tpu.memory_space<vmem>>) attributes {dimension_semantics = [#tpu.dimension_semantics<parallel>], iteration_bounds = array<i64: 2>, scalar_prefetch = 0 : i64, scratch_operands = 0 : i64, tpu.core_type = #tpu.core_type<tc>, window_params = [{transform_indices = @transform_0, window_bounds = array<i64: 1, 32, 256>}, {pipeline_mode = #tpu.pipeline_mode<synchronous>, transform_indices = @transform_1, window_bounds = array<i64: 8, 32>}, {pipeline_mode = #tpu.pipeline_mode<synchronous>, transform_indices = @transform_2, window_bounds = array<i64: 8, 1>}, {pipeline_mode = #tpu.pipeline_mode<synchronous>, transform_indices = @transform_3, window_bounds = array<i64: 32, 8>}, {pipeline_mode = #tpu.pipeline_mode<synchronous>, transform_indices = @transform_4, window_bounds = array<i64: 32, 1>}, {transform_indices = @transform_5, window_bounds = array<i64: 1, 32, 256>}]} {
    %c0 = arith.constant 0 : index
    %c0_0 = arith.constant 0 : index
    %c0_1 = arith.constant 0 : index
    %0 = vector.load %arg1[%c0, %c0_0, %c0_1] : memref<1x32x256xf32, #tpu.memory_space<vmem>>, vector<1x32x256xf32>
    %1 = vector.shape_cast %0 : vector<1x32x256xf32> to vector<32x256xf32>
    %cst = arith.constant dense<0.000000e+00> : vector<32xf32>
    %2 = vector.multi_reduction <add>, %1, %cst [1] : vector<32x256xf32> to vector<32xf32>
    %3 = vector.shape_cast %2 : vector<32xf32> to vector<32x1xf32>
    %cst_2 = arith.constant 3.906250e-03 : f32
    %4 = vector.broadcast %cst_2 : f32 to vector<32x1xf32>
    %5 = arith.mulf %3, %4 : vector<32x1xf32>
    %c0_3 = arith.constant 0 : index
    %c0_4 = arith.constant 0 : index
    %6 = vector.load %arg2[%c0_3, %c0_4] : memref<8x32xf32, #tpu.memory_space<vmem>>, vector<8x32xf32>
    %cst_5 = arith.constant dense<0.000000e+00> : vector<8x1xf32>
    %7 = tpu.matmul %6, %5, %cst_5 {dimension_numbers = #tpu.dot_dimension_numbers<[1], [0], [0], [1], [0, 0, 1, 1], [], []>} : vector<8x32xf32>, vector<32x1xf32>, vector<8x1xf32> -> vector<8x1xf32>
    %c0_6 = arith.constant 0 : index
    %c0_7 = arith.constant 0 : index
    %8 = vector.load %arg3[%c0_6, %c0_7] : memref<8x1xf32, #tpu.memory_space<vmem>>, vector<8x1xf32>
    %9 = arith.addf %7, %8 : vector<8x1xf32>
    %cst_8 = arith.constant 0.000000e+00 : f32
    %10 = vector.broadcast %cst_8 : f32 to vector<8x1xf32>
    %11 = arith.maximumf %9, %10 : vector<8x1xf32>
    %c0_9 = arith.constant 0 : index
    %c0_10 = arith.constant 0 : index
    %12 = vector.load %arg4[%c0_9, %c0_10] : memref<32x8xf32, #tpu.memory_space<vmem>>, vector<32x8xf32>
    %cst_11 = arith.constant dense<0.000000e+00> : vector<32x1xf32>
    %13 = tpu.matmul %12, %11, %cst_11 {dimension_numbers = #tpu.dot_dimension_numbers<[1], [0], [0], [1], [0, 0, 1, 1], [], []>} : vector<32x8xf32>, vector<8x1xf32>, vector<32x1xf32> -> vector<32x1xf32>
    %c0_12 = arith.constant 0 : index
    %c0_13 = arith.constant 0 : index
    %14 = vector.load %arg5[%c0_12, %c0_13] : memref<32x1xf32, #tpu.memory_space<vmem>>, vector<32x1xf32>
    %15 = arith.addf %13, %14 : vector<32x1xf32>
    %16 = arith.negf %15 : vector<32x1xf32>
    %17 = math.exp %16 : vector<32x1xf32>
    %cst_14 = arith.constant 1.000000e+00 : f32
    %18 = vector.broadcast %cst_14 : f32 to vector<32x1xf32>
    %19 = arith.addf %18, %17 : vector<32x1xf32>
    %20 = arith.divf %18, %19 : vector<32x1xf32>
    %21 = vector.broadcast %20 : vector<32x1xf32> to vector<32x256xf32>
    %22 = arith.mulf %1, %21 : vector<32x256xf32>
    %c0_15 = arith.constant 0 : index
    %c0_16 = arith.constant 0 : index
    %c0_17 = arith.constant 0 : index
    %23 = vector.load %arg6[%c0_15, %c0_16, %c0_17] : memref<1x32x256xf32, #tpu.memory_space<vmem>>, vector<1x32x256xf32>
    %24 = vector.shape_cast %23 : vector<1x32x256xf32> to vector<32x256xf32>
    %25 = vector.shape_cast %22 : vector<32x256xf32> to vector<1x32x256xf32>
    tpu.vector_store %arg6[%c0_15, %c0_16, %c0_17], %25 {strides = array<i32>} : memref<1x32x256xf32, #tpu.memory_space<vmem>>, vector<1x32x256xf32>,
    return
  }
  func.func @transform_0(%arg0: i32) -> (i32, i32, i32) {
    %c0_i32 = arith.constant 0 : i32
    %c0_i32_0 = arith.constant 0 : i32
    %c0_i32_1 = arith.constant 0 : i32
    return %arg0, %c0_i32, %c0_i32_0 : i32, i32, i32
  }
  func.func @transform_1(%arg0: i32) -> (i32, i32) {
    %c0_i32 = arith.constant 0 : i32
    %c0_i32_0 = arith.constant 0 : i32
    %c0_i32_1 = arith.constant 0 : i32
    return %c0_i32, %c0_i32_0 : i32, i32
  }
  func.func @transform_2(%arg0: i32) -> (i32, i32) {
    %c0_i32 = arith.constant 0 : i32
    %c0_i32_0 = arith.constant 0 : i32
    %c0_i32_1 = arith.constant 0 : i32
    return %c0_i32, %c0_i32_0 : i32, i32
  }
  func.func @transform_3(%arg0: i32) -> (i32, i32) {
    %c0_i32 = arith.constant 0 : i32
    %c0_i32_0 = arith.constant 0 : i32
    %c0_i32_1 = arith.constant 0 : i32
    return %c0_i32, %c0_i32_0 : i32, i32
  }
  func.func @transform_4(%arg0: i32) -> (i32, i32) {
    %c0_i32 = arith.constant 0 : i32
    %c0_i32_0 = arith.constant 0 : i32
    %c0_i32_1 = arith.constant 0 : i32
    return %c0_i32, %c0_i32_0 : i32, i32
  }
  func.func @transform_5(%arg0: i32) -> (i32, i32, i32) {
    %c0_i32 = arith.constant 0 : i32
    %c0_i32_0 = arith.constant 0 : i32
    %c0_i32_1 = arith.constant 0 : i32
    return %arg0, %c0_i32, %c0_i32_0 : i32, i32, i32
  }
}

</mosaic_0001>

<bundles_post_ra>
// kernel: tpu_custom_call.1
= control target key start
LH: loop header
LB: loop body
LE: loop exit
PB: predicated region body
PF: predicated region fallthrough
CT: control target
= control target key end

     0   :  { %10 = vsyncpa [#allocation3], 0  ;;  %s1075_s0 = inlined_call_operand.hbm [shape: f32[2,32,256], index: 0, kind: input, shape index: {}]   ;;  %s1076_s1 = inlined_call_operand.vmem [shape: f32[8,32], index: 1, kind: input, shape index: {}]   ;;  %s1077_s2 = inlined_call_operand.vmem [shape: f32[8,1], index: 2, kind: input, shape index: {}]   ;;  %s1078_s3 = inlined_call_operand.vmem [shape: f32[32,8], index: 3, kind: input, shape index: {}]   ;;  %s1079_s4 = inlined_call_operand.vmem [shape: f32[32,1], index: 4, kind: input, shape index: {}]   ;;  %s1080_s5 = inlined_call_operand.hbm [shape: f32[2,32,256], index: 5, kind: output, shape index: {}]  }
   0x1   :  { %12 = vsyncpa [#allocation3 + $0x1], 0 }
   0x2   :  { %13 = vsyncpa [#allocation4], 0 }
   0x3   :  { %15 = vsyncpa [#allocation4 + $0x1], 0  ;;  %s855_s18 = smov 0   ;;  %s857_s19 = smov 0  }
   0x4   :  { %s859_s20 = smov 0   ;;  %s861_s21 = smov 0  }
   0x5 LB: > { %s876_s22 = sadd.s32 4294967295, %s814_s21   ;;  %s597_s23 = sadd.s32 4294967294, %s814_s21   ;;  %s814_s21 = sphi %s861_s21, %s1095_s21   ;;  %s810_s20 = sphi %s859_s20, %s1094_s20   ;;  %s806_s19 = sphi %s857_s19, %s1093_s19   ;;  %s802_s18 = sphi %s855_s18, %s1092_s18  }
   0x6   : > { %s880_s24 = sadd.s32 1, %s814_s21   ;;  %s28_s25 = sadd.s32 1, %s810_s20 }
   0x7   : > { %s25_s26 = ssub.s32 %s814_s21, %s880_s24  ;;  %p35_p0 = scmp.ne.s32.totalorder %s810_s20, %s806_s19 }
   0x8   : > { %p26_p1 = scmp.eq.s32.totalorder %s25_s26, 0  ;;  %p36_p2 = scmp.eq.s32.totalorder %s814_s21, 0 }
   0x9   : > { %p41_p3 = scmp.ne.s32.totalorder %s806_s19, %s802_s18  ;;  %p42_p4 = scmp.eq.s32.totalorder %s876_s22, 0 }
   0xa   : > { %s892_s27 = scalar_select %p26_p1, %s810_s20, %s28_s25  }
   0xb   : > { %p894_p5 = por %p36_p2, %p35_p0  ;;  %p898_p6 = por %p42_p4, %p41_p3 }
   0xc   : > { %p149_p7 = scmp.eq.s32.totalorder %s876_s22, 1  ;;  %p155_p8 = scmp.eq.s32.totalorder %s597_s23, 1 }
   0xd   : > { %s1084_s29 = scalar_select %p898_p6, 1, 0 }
   0xe   : > { %p663_p10 = scmp.lt.s32.totalorder %s814_s21, 2  ;;  %p905_p11 = por %p149_p7, %p35_p0 }
   0xf   : > { %p909_p12 = por %p155_p8, %p41_p3  ;;  %s187_s7 = sand.u32 1, %s810_s20  }
  0x10   : > { %s1085_s30 = scalar_select %p905_p11, 1, 0 }
  0x11   : > { %s1086_s6 = scalar_select %p909_p12, 1, 0 }
  0x12   : > { %s620_s8 = sshll.u32 %s814_s21, 10  ;;  %s600_s9 = sshll.u32 %s187_s7, 6 }
  0x13   : > { %s918_s12 = scalar_lea.hbm %s1075_s0, %s620_s8  ;;  %s191_s13 = scalar_lea.vmem [#allocation2], %s600_s9 }
  0x14   : > { %s198_s14 = sshll.u32 %s191_s13, 4  ;;  %p922_p13 = pnand %p663_p10, %p894_p5  ;;  %s926_s14 = int_to_ptr.vmem [resolvable:$true] %s198_s14 }
  0x15   : > { %s928_s16 = scalar_lea.sflag [#allocation3], %s187_s7  ;;  %s722_s17 = scalar_lea.hbm %s918_s12, 1024 }
  0x16   : > { %p723_p0 = scmp.ne.s32.totalorder %s918_s12, %s722_s17  ;;  %p724_p1 = pneg %p922_p13 }
  0x17   : > { %s727_s26 = scalar_lea.hbm %s1075_s0, 2048  ;;  %p728_p4 = scmp.lt.s32.totalorder %s918_s12, %s1075_s0 }
  0x18   : > { %p725_p2 = pnand %p724_p1, %p723_p0  ;;  %p729_p5 = scmp.lt.s32.totalorder %s727_s26, %s722_s17 }
  0x1a   : > { %p726_p3 = pneg %p725_p2  ;;  %p730_p7 = por %p729_p5, %p728_p4 }
  0x1c   : > { %p731_p8 = pnand %p730_p7, %p726_p3 }
  0x1e   : > { %734 = shalt.err (!%p731_p8)
}
  0x1f   : > { %s735_s7 = scalar_lea.vmem %s926_s14, 1024  ;;  %s816_s9 = smov [#allocation2]  }
  0x20   : > { %p736_p10 = scmp.ne.s32.totalorder %s926_s14, %s735_s7  ;;  %s740_s10 = sshll.u32 %s816_s9, 4  ;;  %s741_s10 = int_to_ptr.vmem [resolvable:$false] %s740_s10 }
  0x21   : > { %s742_s11 = scalar_lea.vmem %s741_s10, 2048  ;;  %p743_p2 = scmp.lt.s32.totalorder %s926_s14, %s741_s10 }
  0x22   : > { %p738_p9 = pnand %p736_p10, %p724_p1  ;;  %p744_p12 = scmp.lt.s32.totalorder %s742_s11, %s735_s7 }
  0x24   : > { %p739_p0 = pneg %p738_p9  ;;  %p745_p11 = por %p744_p12, %p743_p2 }
  0x26   : > { %p746_p6 = pnand %p745_p11, %p739_p0 }
  0x28   : > { %749 = shalt.err (!%p746_p6)
}
  0x29   : > { %s817_s13 = smov 256   ;;  %s818_s17 = smov 16  }
  0x2a   : > { %658 = dma.hbm_to_vmem [thread:$0]  (!%p922_p13), %s918_s12, 1024, %s926_s14, %s928_s16, %s817_s13, %s817_s13, %s818_s17  }
  0x2b   : > { %p603_p9 = scmp.ge.s32.totalorder %s814_s21, 1  ;;  %p206_p1 = scmp.lt.s32.totalorder %s814_s21, 3 }
  0x2d   : > { %p207_p3 = pnand %p603_p9, %p206_p1 }
  0x2e   : > { %s952_s23 = sand.u32 (!%p207_p3), 1, %s806_s19   ;;  %p1088_p6 = scmp.ne.s32.totalorder (!%p207_p3), %s1084_s29, 0 }
  0x2f   : > { %210 = sbr.rel (%p207_p3) target bundleno = 781 (0x30d), region = 40  ;;  %s604_s25 = sshll.u32 (!%p207_p3), %s952_s23, 6 }
  0x30   : > { %s213_s26 = scalar_lea.sflag (!%p207_p3), [#allocation3], %s952_s23  ;;  %s216_s28 = scalar_lea.vmem (!%p207_p3), [#allocation2], %s604_s25 }
  0x34   : > { %793 = dma.done.wait (%p1088_p6), %s213_s26, 1024  }
  0x35   : > { %795 = vsyncadd (%p1088_p6), %s213_s26, 4294966272  ;;  %v962_v0 = vld [vmem:[%s216_s28 + $0x30] sm:$0xff]  ;;  %v964_v1 = vld [vmem:[%s216_s28 + $0x38] sm:$0xff]  ;;  %v819_v12 = vmov 0.0   ;;  %vm820_vm0 = vmmov 0   ;;  %vm269_vm1 = vcmask 261120  }
  0x36   : > { %v966_v2 = vld [vmem:[%s216_s28 + $0x20] sm:$0xff]  ;;  %v260_v3 = vadd.f32 %v964_v1, %v962_v0  ;;  %v970_v4 = vld [vmem:[%s216_s28 + $0x28] sm:$0xff]  ;;  %v972_v5 = vld [vmem:[%s216_s28 + $0x10] sm:$0xff]  ;;  %632 = vmatprep.subr.mxu0 %v819_v12  ;;  %640 = vmatprep.mubr.msk.f32.mxu0 %vm820_vm0, %v819_v12  ;;  %vm352_vm2 = vcmask 64512   ;;  %v821_v31 = vmov 0   ;;  %s242_s7 = scalar_lea.vmem [#allocation5], %s604_s25 }
  0x37   : > { %v974_v6 = vld [vmem:[%s216_s28 + $0x18] sm:$0xff]  ;;  %v978_v8 = vld [vmem:[%s216_s28] sm:$0xff]  ;;  %v980_v9 = vld [vmem:[%s216_s28 + $0x8] sm:$0xff]  ;;  %v257_v10 = vadd.f32 %v970_v4, %v966_v2  ;;  %705 = vset.pattern.permute.xlu1 %v821_v31  ;;  %704 = vset.pattern.permute.xlu0 %v821_v31  ;;  %s524_s9 = sshll.u32 %s242_s7, 4  ;;  %s621_s10 = sshll.u32 %s876_s22, 10  ;;  %s1025_s9 = int_to_ptr.vmem [resolvable:$true] %s524_s9 }
  0x38   : > { %v254_v7 = vadd.f32 %v974_v6, %v972_v5  ;;  %261 = vadd.xlane.f32.xlu0 %v260_v3  ;;  %v251_v11 = vadd.f32 %v980_v9, %v978_v8  ;;  %v267_v21 = vld [vmem:[%s1076_s1] sm:$0xff]  ;;  %v345_v28 = vld [vmem:[%s1078_s3 + $0x8] sm:$0xff]  ;;  %v346_v29 = vld [vmem:[%s1078_s3 + $0x10] sm:$0xff]  ;;  %s1030_s13 = scalar_lea.hbm %s1080_s5, %s621_s10  ;;  %s511_s22 = scalar_lea.sflag [#allocation4], %s952_s23 }
  0x39   : > { %v344_v22 = vld [vmem:[%s1078_s3] sm:$0xff]  ;;  %v347_v30 = vld [vmem:[%s1078_s3 + $0x18] sm:$0xff]  ;;  %v349_v32 = vld [vmem:[%s1079_s4 + $0x8] sm:$0xff]  ;;  %s750_s17 = scalar_lea.vmem %s1025_s9, 1024  ;;  %p1089_p12 = scmp.ne.s32.totalorder %s1085_s30, 0 }
  0x3a   : > { %255 = vadd.xlane.f32.xlu1 %v254_v7  ;;  %645 = vmatprep.mubr.msk.f32.mxu1 %vm352_vm2, %v344_v22  ;;  %v268_v23 = vld [vmem:[%s1077_s2] sm:$0xff]  ;;  %v351_v37 = vld [vmem:[%s1079_s4 + $0x18] sm:$0xff]  ;;  %v350_v41 = vld [vmem:[%s1079_s4 + $0x10] sm:$0xff]  ;;  %p751_p11 = scmp.ne.s32.totalorder %s1025_s9, %s750_s17  ;;  %s822_s26 = smov [#allocation5]  }
  0x3b   : > { %v348_v34 = vld [vmem:[%s1079_s4] sm:$0xff]  ;;  %s754_s28 = sshll.u32 %s822_s26, 4  ;;  %s755_s28 = int_to_ptr.vmem [resolvable:$false] %s754_s28 }
  0x3c   : > { %258 = vadd.xlane.f32.xlu0 %v257_v10  ;;  %p752_p13 = pnand %p751_p11, %p1089_p12  ;;  %s756_s29 = scalar_lea.vmem %s755_s28, 2048 }
  0x3d   : > { %p757_p5 = scmp.lt.s32.totalorder %s1025_s9, %s755_s28  ;;  %p758_p7 = scmp.lt.s32.totalorder %s756_s29, %s750_s17 }
  0x3e   : > { %252 = vadd.xlane.f32.xlu1 %v251_v11  ;;  %p753_p4 = pneg %p752_p13 }
  0x3f   : > { %p759_p8 = por %p758_p7, %p757_p5 }
  0x41   : > { %p760_p10 = pnand %p759_p8, %p753_p4 }
  0xc1   : > { %v262_v13 = vpop.xlane.xlu0 %261 }
  0xc2   : > { %v266_v14 = vmul.f32 0.00390625, %v262_v13 }
  0xc3   : > { %v256_v15 = vpop.xlane.xlu1 %255 }
  0xc4   : > { %633 = vmatpush3.msra.mxu0 %v266_v14  ;;  %v264_v19 = vmul.f32 0.00390625, %v256_v15 }
  0xc5   : > { %v259_v16 = vpop.xlane.xlu0 %258  ;;  %634 = vmatprep.subr.mxu0 %v819_v12 }
  0xc6   : > { %v265_v17 = vmul.f32 0.00390625, %v259_v16 }
  0xc7   : > { %v253_v18 = vpop.xlane.xlu1 %252 }
  0xc8   : > { %635 = vmatpush3.msra.mxu0 %v265_v17  ;;  %v263_v20 = vmul.f32 0.00390625, %v253_v18 }
  0xc9   : > { %636 = vmatprep.subr.mxu0 %v819_v12 }
  0xca   : > { %637 = vmatpush3.msra.mxu0 %v264_v19 }
  0xcb   : > { %638 = vmatprep.subr.mxu0 %v819_v12 }
  0xcc   : > { %639 = vmatpush3.msra.mxu0 %v263_v20 }
  0xcd   : > { %641 = vmatmul.mubr.msk.f32.vlgmr.msra.gmra.mxu0 %vm269_vm1, %v267_v21 }
 0x18d   : > { %v339_v24 = vpop.f32.mrf.mxu0 }
 0x18e   : > { %v340_v25 = vadd.f32 %v339_v24, %v268_v23 }
 0x18f   : > { %v642_v26 = vpop.f32.mrf.mxu0 }
 0x190   : > { %v343_v27 = vmax.f32 %v340_v25, 0.0 }
 0x192   : > { %643 = vmatprep.subr.mxu1 %v343_v27 }
 0x193   : > { %644 = vmatpush3.msra.mxu1 %v343_v27 }
 0x194   : > { %646 = vmatmul.mubr.msk.f32.vlgmr.msra.gmra.mxu1 %vm352_vm2, %v345_v28 }
 0x195   : > { %648 = vmatprep.mubr.msk.f32.mxu1 %vm352_vm2, %v346_v29 }
 0x198   : > { %649 = vmatmul.mubr.msk.f32.gmra.mxu1 %vm352_vm2, %v347_v30 }
 0x254   : > { %v647_v33 = vpop.f32.mrf.mxu1 }
 0x255   : > { %v437_v35 = vadd.f32 %v647_v33, %v349_v32 }
 0x256   : > { %v431_v36 = vpop.f32.mrf.mxu1 }
 0x257   : > { %v612_v38 = vmul.f32 -1.442695, %v437_v35  ;;  %v432_v39 = vadd.f32 %v431_v36, %v348_v34 }
 0x258   : > { %v650_v40 = vpop.f32.mrf.mxu1 }
 0x259   : > { %706 = vpow2.f32 %v612_v38  ;;  %v611_v42 = vmul.f32 -1.442695, %v432_v39  ;;  %v447_v43 = vadd.f32 %v650_v40, %v351_v37 }
 0x25a   : > { %v441_v44 = vpop.f32.mrf.mxu1 }
 0x25b   : > { %708 = vpow2.f32 %v611_v42  ;;  %v614_v45 = vmul.f32 -1.442695, %v447_v43  ;;  %v442_v46 = vadd.f32 %v441_v44, %v350_v41 }
 0x25d   : > { %v613_v47 = vmul.f32 -1.442695, %v442_v46  ;;  %710 = vpow2.f32 %v614_v45 }
 0x25f   : > { %712 = vpow2.f32 %v613_v47 }
 0x266   : > { %v707_v48 = vpop.eup %706 }
 0x267   : > { %v463_v49 = vadd.f32 1.0, %v707_v48 }
 0x268   : > { %v709_v50 = vpop.eup %708 }
 0x269   : > { %714 = vrcp.f32 %v463_v49  ;;  %v462_v51 = vadd.f32 1.0, %v709_v50 }
 0x26a   : > { %v711_v52 = vpop.eup %710 }
 0x26b   : > { %716 = vrcp.f32 %v462_v51  ;;  %v465_v55 = vadd.f32 1.0, %v711_v52 }
 0x26c   : > { %v713_v53 = vpop.eup %712 }
 0x26d   : > { %v464_v54 = vadd.f32 1.0, %v713_v53 }
 0x26f   : > { %718 = vrcp.f32 %v464_v54 }
 0x270   : > { %720 = vrcp.f32 %v465_v55 }
 0x276   : > { %v715_v56 = vpop.eup %714 }
 0x277   : > { %481 = vperm.xlu1 %705, %v715_v56  }
 0x278   : > { %v717_v57 = vpop.eup %716 }
 0x279   : > { %476 = vperm.xlu0 %704, %v717_v57  }
 0x27c   : > { %v719_v58 = vpop.eup %718 }
 0x27d   : > { %486 = vperm.xlu1 %705, %v719_v58   ;;  %v721_v59 = vpop.eup %720 }
 0x281   : > { %491 = vperm.xlu1 %705, %v721_v59  }
 0x2f2   : > { %v482_v60 = vpop.permute.xlu1 %481 }
 0x2f3   : > { %v496_v61 = vmul.f32 %v482_v60, %v972_v5  ;;  %v497_v62 = vmul.f32 %v482_v60, %v974_v6 }
 0x2f4   : > { %v477_v63 = vpop.permute.xlu0 %476 }
 0x2f5   : > { %504 = vst [vmem:[%s242_s7 + $0x10] sm:$0xff] %v496_v61  ;;  %505 = vst [vmem:[%s242_s7 + $0x18] sm:$0xff] %v497_v62  ;;  %v494_v3 = vmul.f32 %v477_v63, %v978_v8  ;;  %v495_v7 = vmul.f32 %v477_v63, %v980_v9 }
 0x2f7   : > { %502 = vst [vmem:[%s242_s7] sm:$0xff] %v494_v3  ;;  %503 = vst [vmem:[%s242_s7 + $0x8] sm:$0xff] %v495_v7 }
 0x2f8   : > { %v487_v10 = vpop.permute.xlu1 %486 }
 0x2f9   : > { %v498_v11 = vmul.f32 %v487_v10, %v966_v2  ;;  %v499_v5 = vmul.f32 %v487_v10, %v970_v4 }
 0x2fb   : > { %506 = vst [vmem:[%s242_s7 + $0x20] sm:$0xff] %v498_v11  ;;  %507 = vst [vmem:[%s242_s7 + $0x28] sm:$0xff] %v499_v5 }
 0x2fc   : > { %v492_v6 = vpop.permute.xlu1 %491 }
 0x2fd   : > { %v500_v8 = vmul.f32 %v492_v6, %v962_v0  ;;  %v501_v2 = vmul.f32 %v492_v6, %v964_v1 }
 0x2ff   : > { %508 = vst [vmem:[%s242_s7 + $0x30] sm:$0xff] %v500_v8  ;;  %509 = vst [vmem:[%s242_s7 + $0x38] sm:$0xff] %v501_v2 }
 0x300   : > { %763 = shalt.err (!%p760_p10)
}
 0x301   : > { %s764_s12 = scalar_lea.hbm %s1030_s13, 1024  ;;  %s768_s16 = scalar_lea.hbm %s1080_s5, 2048 }
 0x302   : > { %p765_p0 = scmp.ne.s32.totalorder %s1030_s13, %s764_s12  ;;  %p769_p1 = scmp.lt.s32.totalorder %s1030_s13, %s1080_s5 }
 0x303   : > { %p770_p3 = scmp.lt.s32.totalorder %s768_s16, %s764_s12 }
 0x304   : > { %p766_p2 = pnand %p765_p0, %p1089_p12 }
 0x305   : > { %p771_p6 = por %p770_p3, %p769_p1 }
 0x306   : > { %p767_p9 = pneg %p766_p2 }
 0x308   : > { %p772_p11 = pnand %p771_p6, %p767_p9 }
 0x30a   : > { %775 = shalt.err (!%p772_p11)
}
 0x30b   : > { %s823_s10 = smov 256   ;;  %s824_s25 = smov 16  }
 0x30c   : > { %653 = dma.vmem_to_hbm [thread:$0]  (%p1089_p12), %s1025_s9, 1024, %s1030_s13, %s511_s22, %s823_s10, %s823_s10, %s824_s25  }
 0x30d PF: > { %s539_s11 = sand.u32 1, %s802_s18   ;;  %p1090_p13 = scmp.ne.s32.totalorder %s1086_s6, 0 }
 0x30e   : > { %p1091_p4 = scmp.ge.s32.totalorder %s814_s21, 2  ;;  %s540_s17 = scalar_lea.sflag [#allocation4], %s539_s11 }
 0x310   : > { %p660_p5 = pnand %p1091_p4, %p1090_p13 }
 0x312   : > { %p661_p7 = pneg %p660_p5 }
 0x314   : > { %797 = dma.done.wait (%p661_p7), %s540_s17, 1024  }
 0x315   : > { %799 = vsyncadd (%p661_p7), %s540_s17, 4294966272  ;;  %p18_p8 = scmp.ge.s32.totalorder %s880_s24, 4   ;;  %s1092_s18 = smov %s806_s19 }
 0x316   : > { %s1093_s19 = smov %s810_s20  ;;  %s1094_s20 = smov %s892_s27 }
 0x317   : > { %s1095_s21 = smov %s880_s24  ;;  %20 = sbr.rel (!%p18_p8) target bundleno = 5 (0x5), region = 85 }
 0x31c   :  { %545 = vsyncpa [#allocation3], 1 }
 0x31d   :  { %547 = vsyncpa [#allocation3 + $0x1], 1 }
 0x31e   :  { %548 = vsyncpa [#allocation4], 1 }
 0x31f   :  { %550 = vsyncpa [#allocation4 + $0x1], 1 }

</bundles_post_ra>
